<compile_context>
chip_gen: v6e
topology: v6e:2x2x1
jax: 0.10.0
libtpu: 0.0.40
codegen_flags: <defaults>
</compile_context>

<pallas_src>
import math
import functools

import jax
import jax.numpy as jnp
from jax.experimental import pallas as pl
from jax.experimental.pallas import tpu as pltpu


def _round_up(n, m):
    return ((n + m - 1) // m) * m


def _gelu_erf(v):
    # exact erf-based GELU (torch.nn.GELU default)
    return 0.5 * v * (1.0 + jax.lax.erf(v * (1.0 / math.sqrt(2.0))))


def _gelu_fast(v):
    # x * sigmoid(1.702 x): one EUP push + 2 VPU ops (fast-path approximation)
    return v * jax.nn.sigmoid(1.702 * v)


def _fold_bn(gamma, beta, mean, var, eps=1e-5):
    scale = gamma / jnp.sqrt(var + eps)
    shift = beta - mean * scale
    return scale, shift


def _vmem_budget_bytes():
    """Generation-aware scoped-VMEM budget, never above physical capacity."""
    cap = None
    try:
        info = pltpu.get_tpu_info()
        cap = int(getattr(info, "vmem_capacity_bytes", 0)) or None
    except Exception:
        cap = None
    if not cap:
        cap = 64 << 20           # conservative fallback (v7x per-TensorCore VMEM)
    return int(cap * 4 // 5)     # ~20% headroom for compiler-internal scratch


def _prepare(params, *, mm_dtype, do_expansion, Cout):
    """Fold eval-mode BatchNorm scales into the conv weights."""
    b1s, b1b = _fold_bn(*params["bn1"])
    b2s, b2b = _fold_bn(*params["bn2"])
    prep = dict(
        w_dw=params["w_dw"].astype(jnp.float32) * b1s[:, None],
        w_pw=(params["w_pw"].astype(jnp.float32) * b2s[:, None]).astype(mm_dtype),
        b1b=b1b.astype(jnp.float32),
        b2b=b2b.astype(jnp.float32),
        se_w1=params["se_w1"].astype(jnp.float32),
        se_b1=params["se_b1"].astype(jnp.float32),
        se_w2=params["se_w2"].astype(jnp.float32),
        se_b2=params["se_b2"].astype(jnp.float32),
    )
    if do_expansion:
        es, eb = _fold_bn(*params["bn_exp"])
        prep["w_exp"] = (params["w_exp"].astype(jnp.float32) * es[:, None]).astype(mm_dtype)
        prep["eb"] = eb.astype(jnp.float32)
    else:
        prep["w_exp"] = None
        prep["eb"] = jnp.zeros((Cout,), jnp.float32)
    return prep


# ----------------------------- fused single-pass ----------------------------
def _fused_kernel(*refs, K, pad, L, Lout, W, do_expansion, do_residual,
                  mm_dtype, approx_gelu):
    it = iter(refs)
    x_ref = next(it)
    wexp_ref = next(it) if do_expansion else None
    wdw_ref = next(it)
    w1_ref = next(it)
    b1se_ref = next(it)
    w2_ref = next(it)
    wpw_ref = next(it)
    sh_ref = next(it)
    rez_ref = next(it) if do_residual else None
    o_ref = next(it)

    gelu = _gelu_fast if approx_gelu else _gelu_erf
    x = x_ref[0]                                   # (Cin, W), io dtype
    sh = sh_ref[...]                               # (Cout, 4) packed shifts
    eb, b1b, b2b, se_b2 = sh[:, 0:1], sh[:, 1:2], sh[:, 2:3], sh[:, 3:4]
    Cout = sh.shape[0]
    lanes = jax.lax.broadcasted_iota(jnp.int32, (1, W), 1)   # (1, W) only

    # expansion 1x1 conv (BN scale folded into weights) + shift + GELU
    if do_expansion:
        z = jnp.dot(wexp_ref[...], x.astype(mm_dtype),
                    preferred_element_type=jnp.float32)
        z = gelu(z + eb)
    else:
        z = x.astype(jnp.float32)

    # depthwise conv in registers (XLU lane rotations).  Boundary masks are
    # hoisted out of the k-loop: K precomputed (1, W) 0/1 f32 masks so each k
    # is roll + one mask-mul + FMA.
    masks = []
    for k in range(K):
        d = k - pad
        if d == 0 and L == W:
            masks.append(None)
        else:
            masks.append(((lanes + d >= 0) & (lanes + d < L)).astype(jnp.float32))
    wdw = wdw_ref[...]                             # (Cout, K), BN1 scale folded
    acc = jnp.zeros((Cout, W), jnp.float32)
    for k in range(K):                             # K static -> unrolled
        d = k - pad
        v = z if d == 0 else pltpu.roll(z, shift=(-d) % W, axis=1)
        if masks[k] is not None:
            v = v * masks[k]
        acc = acc + wdw[:, k:k + 1] * v
    y = gelu(acc + b1b)
    if Lout < W:
        # zero dead lanes so the squeeze-excite mean stays exact
        y = y * (lanes < Lout).astype(jnp.float32)

    # squeeze-excite.  The two tiny matmuls stay on the MXU here; the L-tiled
    # path moves them into plain-JAX glue between the two passes instead.
    m = jnp.sum(y, axis=1, keepdims=True) * (1.0 / Lout)          # (Cout, 1)
    s1 = gelu(jnp.dot(w1_ref[...], m, preferred_element_type=jnp.float32)
              + b1se_ref[...])
    s2 = jnp.dot(w2_ref[...], s1, preferred_element_type=jnp.float32) + se_b2
    y = y * jax.nn.sigmoid(s2)

    # pointwise 1x1 conv (BN2 scale folded) + shift + GELU
    p = jnp.dot(wpw_ref[...], y.astype(mm_dtype),
                preferred_element_type=jnp.float32)
    p = gelu(p + b2b)
    if Lout < W:
        p = p[:, :Lout]
    # TODO(synk): training-mode dropout / BatchNorm batch statistics are not
    # implemented (eval-mode semantics, matching module.eval()).

    if do_residual:                                # Lout == L on this path
        xo = x[:, :Lout] if Lout < W else x
        p = xo.astype(jnp.float32) + rez_ref[0, 0] * p
    o_ref[0] = p.astype(o_ref.dtype)


def _forward_fused(x, prep, *, K, pad, L, Lout, do_expansion, do_residual,
                   rezero, use_bf16, approx_gelu, out_dtype, budget):
    B, Cin, _ = x.shape
    Cout = prep["w_dw"].shape[0]
    R = prep["se_w1"].shape[0]
    W = _round_up(max(L, Lout), 128)               # lane-aligned compute width
    io_dtype = jnp.bfloat16 if use_bf16 else jnp.float32
    mm_dtype = jnp.bfloat16 if use_bf16 else jnp.float32

    xin = x.astype(io_dtype)                       # bf16 DMA halves x HBM bytes
    if W > L:                                      # no pad op when L is aligned
        xin = jnp.pad(xin, ((0, 0), (0, 0), (0, W - L)))

    shifts = jnp.stack([prep["eb"], prep["b1b"], prep["b2b"], prep["se_b2"]],
                       axis=1).astype(jnp.float32)        # (Cout, 4)

    full2d = lambda a: pl.BlockSpec(a.shape, lambda b: (0, 0))
    args = [xin]
    in_specs = [pl.BlockSpec((1, Cin, W), lambda b: (b, 0, 0))]
    if do_expansion:
        args.append(prep["w_exp"])
        in_specs.append(full2d(prep["w_exp"]))
    dense = [prep["w_dw"], prep["se_w1"], prep["se_b1"].reshape(-1, 1),
             prep["se_w2"], prep["w_pw"], shifts]
    args += dense
    in_specs += [full2d(a) for a in dense]
    if do_residual:
        args.append(jnp.asarray(rezero, jnp.float32).reshape(1, 1))
        in_specs.append(pl.BlockSpec(memory_space=pltpu.MemorySpace.SMEM))

    weight_bytes = sum(int(a.size) * a.dtype.itemsize for a in args[1:])
    out_b = jnp.dtype(out_dtype).itemsize
    x_blk = Cin * W * xin.dtype.itemsize
    o_blk = Cout * Lout * out_b
    vmem_limit = int(min(budget, max(24 << 20,
                                     2 * (x_blk + o_blk) + 2 * weight_bytes
                                     + 10 * Cout * W * 4)))
    cost = pl.CostEstimate(
        flops=int(2 * B * Cout * W * ((Cin if do_expansion else 0) + K + Cout)
                  + 4 * B * R * Cout),
        transcendentals=int(B * (3 * Cout * W + Cout + R)),
        bytes_accessed=int(B * (x_blk + o_blk) + weight_bytes))

    kernel = functools.partial(
        _fused_kernel, K=K, pad=pad, L=L, Lout=Lout, W=W,
        do_expansion=do_expansion, do_residual=do_residual,
        mm_dtype=mm_dtype, approx_gelu=approx_gelu)

    return pl.pallas_call(
        kernel,
        out_shape=jax.ShapeDtypeStruct((B, Cout, Lout), out_dtype),
        grid_spec=pltpu.PrefetchScalarGridSpec(
            num_scalar_prefetch=0,
            grid=(B,),
            in_specs=in_specs,
            out_specs=pl.BlockSpec((1, Cout, Lout), lambda b: (b, 0, 0)),
        ),
        compiler_params=pltpu.CompilerParams(
            dimension_semantics=("parallel",),
            vmem_limit_bytes=vmem_limit),
        cost_estimate=cost,
    )(*args)


# ----------------------------- L-tiled two-pass -----------------------------
def _dw_stats_kernel(*refs, K, pad, L, Lout, TL, Hc, do_expansion,
                     mm_dtype, approx_gelu):
    it = iter(refs)
    xc_ref = next(it)
    xn_ref = next(it)
    wexp_ref = next(it) if do_expansion else None
    wdw_ref = next(it)
    sh_ref = next(it)
    y_ref = next(it)
    psum_ref = next(it)

    gelu = _gelu_fast if approx_gelu else _gelu_erf
    l = pl.program_id(1)
    base = l * TL                                   # padded-coord column of lane 0
    TLW = TL + Hc
    sh = sh_ref[...]
    eb, b1b = sh[:, 0:1], sh[:, 1:2]
    Cout = sh.shape[0]
    lanes = jax.lax.broadcasted_iota(jnp.int32, (1, TLW), 1)

    xc = xc_ref[0]                                  # (Cin, TL)
    xnh = xn_ref[0][:, :Hc]                         # halo from the next tile
    if do_expansion:
        zc = jnp.dot(wexp_ref[...], xc.astype(mm_dtype),
                     preferred_element_type=jnp.float32)
        zn = jnp.dot(wexp_ref[...], xnh.astype(mm_dtype),
                     preferred_element_type=jnp.float32)
        zwin = gelu(jnp.concatenate([zc, zn], axis=1) + eb)
        # zero the conv-padding / tail columns (the input is zero there but the
        # expansion BN shift + GELU is not); one mask per tile, not per k.
        g = lanes + base
        zwin = zwin * ((g >= pad) & (g < pad + L)).astype(jnp.float32)
    else:
        zwin = jnp.concatenate([xc, xnh], axis=1).astype(jnp.float32)

    # depthwise: mask-free (HBM-side zero padding is the conv padding; roll
    # wrap-around only lands in the unused halo columns >= TL).
    wdw = wdw_ref[...]
    acc = jnp.zeros((Cout, TLW), jnp.float32)
    for k in range(K):
        v = zwin if k == 0 else pltpu.roll(zwin, shift=(-k) % TLW, axis=1)
        acc = acc + wdw[:, k:k + 1] * v
    y = gelu(acc[:, :TL] + b1b)
    y_ref[0] = y.astype(y_ref.dtype)

    # squeeze-excite partial sums over the valid output columns only
    out_pos = lanes[:, :TL] + base
    ps = jnp.sum(y * (out_pos < Lout).astype(jnp.float32), axis=1, keepdims=True)

    @pl.when(l == 0)
    def _():
        psum_ref[0] = ps

    @pl.when(l > 0)
    def _():
        psum_ref[0] = psum_ref[0] + ps


def _gate_pw_kernel(*refs, do_residual, mm_dtype, approx_gelu):
    it = iter(refs)
    y_ref = next(it)
    g_ref = next(it)
    wpw_ref = next(it)
    b2b_ref = next(it)
    x_ref = next(it) if do_residual else None
    rez_ref = next(it) if do_residual else None
    o_ref = next(it)

    gelu = _gelu_fast if approx_gelu else _gelu_erf
    y = y_ref[0].astype(jnp.float32) * g_ref[0]                 # SE gate
    p = jnp.dot(wpw_ref[...], y.astype(mm_dtype),
                preferred_element_type=jnp.float32)
    p = gelu(p + b2b_ref[...])
    if do_residual:
        p = x_ref[0].astype(jnp.float32) + rez_ref[0, 0] * p
    o_ref[0] = p.astype(o_ref.dtype)


def _forward_tiled(x, prep, *, K, pad, L, Lout, TL, do_expansion, do_residual,
                   rezero, use_bf16, approx_gelu, out_dtype, budget):
    B, Cin, _ = x.shape
    Cout = prep["w_dw"].shape[0]
    io_dtype = jnp.bfloat16 if use_bf16 else jnp.float32
    mm_dtype = jnp.bfloat16 if use_bf16 else jnp.float32
    io_b = jnp.dtype(io_dtype).itemsize
    out_b = jnp.dtype(out_dtype).itemsize

    Hc = max(_round_up(K - 1, 128), 128)            # lane-aligned halo width
    assert TL % 128 == 0 and TL >= Hc, "tile_len must be a multiple of 128 and >= the halo"
    nT = (Lout + TL - 1) // TL
    Lp = nT * TL                                    # padded output length
    Wx = (nT + 1) * TL                              # padded input (spare halo block)

    # HBM-side zero padding doubles as the depthwise conv's zero padding.
    xw = jnp.pad(x.astype(io_dtype), ((0, 0), (0, 0), (pad, Wx - L - pad)))
    sh1 = jnp.stack([prep["eb"], prep["b1b"]], axis=1).astype(jnp.float32)

    # ---- pass 1: expansion + depthwise + BN1 + GELU + SE partial sums ------
    if TL % Hc == 0:   # narrow halo block when it tiles the padded array
        nxt_spec = pl.BlockSpec((1, Cin, Hc), lambda b, l: (b, 0, (l + 1) * (TL // Hc)))
    else:
        nxt_spec = pl.BlockSpec((1, Cin, TL), lambda b, l: (b, 0, l + 1))
    args1 = [xw, xw]
    in_specs1 = [pl.BlockSpec((1, Cin, TL), lambda b, l: (b, 0, l)), nxt_spec]
    if do_expansion:
        args1.append(prep["w_exp"])
        in_specs1.append(pl.BlockSpec(prep["w_exp"].shape, lambda b, l: (0, 0)))
    args1 += [prep["w_dw"], sh1]
    in_specs1 += [pl.BlockSpec(prep["w_dw"].shape, lambda b, l: (0, 0)),
                  pl.BlockSpec(sh1.shape, lambda b, l: (0, 0))]

    w1_bytes = sum(int(a.size) * a.dtype.itemsize for a in args1[2:])
    blk1 = (2 * Cin * TL + Cout * TL) * io_b + Cout * 4
    vmem1 = int(min(budget, max(16 << 20,
                                2 * blk1 + 2 * w1_bytes + 8 * Cout * (TL + Hc) * 4)))
    cost1 = pl.CostEstimate(
        flops=int(2 * B * nT * Cout * (TL + Hc) * ((Cin if do_expansion else 0) + K)),
        transcendentals=int(B * nT * Cout * (2 * TL + Hc)),
        bytes_accessed=int(2 * B * Cin * Wx * io_b + B * Cout * (Lp * io_b + 4) + w1_bytes))

    kernel1 = functools.partial(
        _dw_stats_kernel, K=K, pad=pad, L=L, Lout=Lout, TL=TL, Hc=Hc,
        do_expansion=do_expansion, mm_dtype=mm_dtype, approx_gelu=approx_gelu)

    y, psum = pl.pallas_call(
        kernel1,
        out_shape=(jax.ShapeDtypeStruct((B, Cout, Lp), io_dtype),
                   jax.ShapeDtypeStruct((B, Cout, 1), jnp.float32)),
        grid_spec=pltpu.PrefetchScalarGridSpec(
            num_scalar_prefetch=0,
            grid=(B, nT),
            in_specs=in_specs1,
            out_specs=(pl.BlockSpec((1, Cout, TL), lambda b, l: (b, 0, l)),
                       pl.BlockSpec((1, Cout, 1), lambda b, l: (b, 0, 0))),
        ),
        compiler_params=pltpu.CompilerParams(
            dimension_semantics=("parallel", "arbitrary"),
            vmem_limit_bytes=vmem1),
        cost_estimate=cost1,
    )(*args1)

    # ---- squeeze-excite gate on (B, Cout) means: plain-JAX glue ------------
    gelu_j = _gelu_fast if approx_gelu else _gelu_erf
    mean = psum[:, :, 0] * (1.0 / Lout)
    s1 = gelu_j(mean @ prep["se_w1"].T + prep["se_b1"])
    gate = jax.nn.sigmoid(s1 @ prep["se_w2"].T + prep["se_b2"])
    gate = gate[:, :, None].astype(jnp.float32)                   # (B, Cout, 1)

    # ---- pass 2: gate * y -> pointwise 1x1 -> BN2 -> GELU -> residual ------
    res_in_kernel = do_residual and (Lout % TL == 0)   # do_residual => Lout == L
    args2 = [y, gate, prep["w_pw"], prep["b2b"].reshape(-1, 1)]
    in_specs2 = [pl.BlockSpec((1, Cout, TL), lambda b, l: (b, 0, l)),
                 pl.BlockSpec((1, Cout, 1), lambda b, l: (b, 0, 0)),
                 pl.BlockSpec(prep["w_pw"].shape, lambda b, l: (0, 0)),
                 pl.BlockSpec((Cout, 1), lambda b, l: (0, 0))]
    if res_in_kernel:
        args2 += [x.astype(io_dtype), jnp.asarray(rezero, jnp.float32).reshape(1, 1)]
        in_specs2 += [pl.BlockSpec((1, Cin, TL), lambda b, l: (b, 0, l)),
                      pl.BlockSpec(memory_space=pltpu.MemorySpace.SMEM)]

    w2_bytes = sum(int(a.size) * a.dtype.itemsize for a in args2[2:4])
    blk2 = Cout * TL * (io_b + out_b) + (Cin * TL * io_b if res_in_kernel else 0)
    vmem2 = int(min(budget, max(16 << 20, 2 * blk2 + 2 * w2_bytes + 6 * Cout * TL * 4)))
    cost2 = pl.CostEstimate(
        flops=int(2 * B * nT * Cout * Cout * TL),
        transcendentals=int(B * Cout * Lp),
        bytes_accessed=int(B * Cout * Lp * (io_b + out_b) + B * Cout * 4 + w2_bytes
                           + (B * Cin * Lp * io_b if res_in_kernel else 0)))

    kernel2 = functools.partial(
        _gate_pw_kernel, do_residual=res_in_kernel, mm_dtype=mm_dtype,
        approx_gelu=approx_gelu)

    out = pl.pallas_call(
        kernel2,
        out_shape=jax.ShapeDtypeStruct((B, Cout, Lp), out_dtype),
        grid_spec=pltpu.PrefetchScalarGridSpec(
            num_scalar_prefetch=0,
            grid=(B, nT),
            in_specs=in_specs2,
            out_specs=pl.BlockSpec((1, Cout, TL), lambda b, l: (b, 0, l)),
        ),
        compiler_params=pltpu.CompilerParams(
            dimension_semantics=("parallel", "parallel"),
            vmem_limit_bytes=vmem2),
        cost_estimate=cost2,
    )(*args2)

    if Lp > Lout:
        out = out[:, :, :Lout]
    if do_residual and not res_in_kernel:
        out = (x.astype(jnp.float32)
               + jnp.asarray(rezero, jnp.float32) * out.astype(jnp.float32)).astype(out_dtype)
    return out


# ------------------------------- public entry -------------------------------
def convblock_forward(x, params, *, kernel_size, padding, use_bf16=True,
                      approx_gelu=True, out_dtype=jnp.float32, tile_len=None):
    """convblock.forward (seperable=True path, stride=1, dilation=1, eval mode).

    x: (B, Cin, L) -> (B, Cout, Lout).  Note: use_bf16 / approx_gelu defaults
    select the fast path, which is not bit-comparable to the torch reference.
    """
    B, Cin, L = x.shape
    Cout, K = params["w_dw"].shape
    assert K == kernel_size
    Lout = L + 2 * padding - K + 1
    do_expansion = (Cin != Cout)
    do_residual = (Cin == Cout) and (Lout == L)
    mm_dtype = jnp.bfloat16 if use_bf16 else jnp.float32
    prep = _prepare(params, mm_dtype=mm_dtype, do_expansion=do_expansion, Cout=Cout)
    budget = _vmem_budget_bytes()
    rezero = params.get("rezero", 0.0)

    if tile_len is None:
        W = _round_up(max(L, Lout), 128)
        io_b = 2 if use_bf16 else 4
        est = (2 * (Cin * W * io_b + Cout * Lout * jnp.dtype(out_dtype).itemsize)
               + 10 * Cout * W * 4)
        if est <= budget:
            return _forward_fused(x, prep, K=K, pad=padding, L=L, Lout=Lout,
                                  do_expansion=do_expansion, do_residual=do_residual,
                                  rezero=rezero, use_bf16=use_bf16,
                                  approx_gelu=approx_gelu, out_dtype=out_dtype,
                                  budget=budget)
        hc = max(_round_up(K - 1, 128), 128)
        tile_len = max(min(1024, _round_up(Lout, 128)), hc)
    return _forward_tiled(x, prep, K=K, pad=padding, L=L, Lout=Lout, TL=tile_len,
                          do_expansion=do_expansion, do_residual=do_residual,
                          rezero=rezero, use_bf16=use_bf16, approx_gelu=approx_gelu,
                          out_dtype=out_dtype, budget=budget)


# ---------------- pure-JAX reference (for correctness check) ----------------
def reference_forward(x, params, *, kernel_size, padding, approx_gelu=False):
    B, Cin, L = x.shape
    Cout, K = params["w_dw"].shape
    Lout = L + 2 * padding - K + 1
    gelu = _gelu_fast if approx_gelu else _gelu_erf
    z = x
    if Cin != Cout:
        es, eb = _fold_bn(*params["bn_exp"])
        z = jnp.einsum("oi,bil->bol", params["w_exp"], x)
        z = gelu(z * es[None, :, None] + eb[None, :, None])
    zp = jnp.pad(z, ((0, 0), (0, 0), (padding, padding)))
    y = sum(params["w_dw"][None, :, k, None] * zp[:, :, k:k + Lout] for k in range(K))
    b1s, b1b = _fold_bn(*params["bn1"])
    y = gelu(y * b1s[None, :, None] + b1b[None, :, None])
    m = y.mean(axis=2)
    s1 = gelu(m @ params["se_w1"].T + params["se_b1"])
    gate = jax.nn.sigmoid(s1 @ params["se_w2"].T + params["se_b2"])
    y = y * gate[:, :, None]
    p = jnp.einsum("oi,bil->bol", params["w_pw"], y)
    b2s, b2b = _fold_bn(*params["bn2"])
    p = gelu(p * b2s[None, :, None] + b2b[None, :, None])
    if (Cin == Cout) and (Lout == L):
        return x + params["rezero"] * p
    return p


def make_params(key, Cin, Cout, K, R=32):
    ks = jax.random.split(key, 10)
    u = lambda k, shape, s=0.1: s * jax.random.normal(k, shape, jnp.float32)
    bn = lambda k: (1.0 + 0.1 * jax.random.normal(jax.random.fold_in(k, 0), (Cout,), jnp.float32),
                    0.1 * jax.random.normal(jax.random.fold_in(k, 1), (Cout,), jnp.float32),
                    0.1 * jax.random.normal(jax.random.fold_in(k, 2), (Cout,), jnp.float32),
                    0.5 + jax.random.uniform(jax.random.fold_in(k, 3), (Cout,), jnp.float32))
    return dict(
        w_exp=u(ks[0], (Cout, Cin)),        # Conv1d(Cin, Cout, 1) weight, squeezed
        bn_exp=bn(ks[1]),                   # (gamma, beta, running_mean, running_var)
        w_dw=u(ks[2], (Cout, K)),           # depthwise Conv1d weight (Cout, 1, K), squeezed
        bn1=bn(ks[3]),
        se_w1=u(ks[4], (R, Cout)),          # squeeze_excite fc1 (squeeze=32 -> R=32)
        se_b1=u(ks[5], (R,)),
        se_w2=u(ks[6], (Cout, R)),          # squeeze_excite fc2
        se_b2=u(ks[7], (Cout,)),
        w_pw=u(ks[8], (Cout, Cout)),        # pointwise Conv1d(Cout, Cout, 1) weight
        bn2=bn(ks[9]),
        rezero=jnp.array(0.25, jnp.float32),  # torch init is 0; nonzero to exercise path
    )


if __name__ == "__main__":
    key = jax.random.PRNGKey(0)
    kx, kp1, kp2, kp3, kp4 = jax.random.split(key, 5)

    def check(out, ref, rtol, atol, name):
        assert out.shape == ref.shape, (name, out.shape, ref.shape)
        o32 = out.astype(jnp.float32)
        err = float(jnp.max(jnp.abs(o32 - ref)))
        assert jnp.allclose(o32, ref, rtol=rtol, atol=atol), (name, err)

    # A: fused path, expansion (Cin != Cout), non-lane-aligned L, fast mode
    #    (bf16 activation DMA / MXU operands + sigmoid-approx GELU).
    B, Cin, Cout, K, pad = 2, 8, 16, 5, 2
    xA = jax.random.normal(kx, (B, Cin, 96), jnp.float32)
    pA = make_params(kp1, Cin, Cout, K)
    outA = convblock_forward(xA, pA, kernel_size=K, padding=pad,
                             use_bf16=True, approx_gelu=True)
    jax.block_until_ready(outA)
    refA = reference_forward(xA, pA, kernel_size=K, padding=pad, approx_gelu=True)
    check(outA, refA, 3e-2, 3e-2, "A")

    # B: fused path, rezero residual (Cin == Cout), lane-aligned L, exact mode.
    xB = jax.random.normal(jax.random.fold_in(kx, 1), (B, Cout, 128), jnp.float32)
    pB = make_params(kp2, Cout, Cout, K)
    outB = convblock_forward(xB, pB, kernel_size=K, padding=pad,
                             use_bf16=False, approx_gelu=False)
    jax.block_until_ready(outB)
    refB = reference_forward(xB, pB, kernel_size=K, padding=pad, approx_gelu=False)
    check(outB, refB, 1e-4, 1e-4, "B")

    # C: L-tiled two-pass path (forced tile_len=128), expansion, fast mode.
    xC = jax.random.normal(jax.random.fold_in(kx, 2), (B, Cin, 200), jnp.float32)
    pC = make_params(kp3, Cin, Cout, K)
    outC = convblock_forward(xC, pC, kernel_size=K, padding=pad,
                             use_bf16=True, approx_gelu=True, tile_len=128)
    jax.block_until_ready(outC)
    refC = reference_forward(xC, pC, kernel_size=K, padding=pad, approx_gelu=True)
    check(outC, refC, 3e-2, 3e-2, "C")

    # D: L-tiled path with in-kernel rezero residual, exact mode.
    xD = jax.random.normal(jax.random.fold_in(kx, 3), (B, Cout, 256), jnp.float32)
    pD = make_params(kp4, Cout, Cout, K)
    outD = convblock_forward(xD, pD, kernel_size=K, padding=pad,
                             use_bf16=False, approx_gelu=False, tile_len=128)
    jax.block_until_ready(outD)
    refD = reference_forward(xD, pD, kernel_size=K, padding=pad, approx_gelu=False)
    check(outD, refD, 1e-4, 1e-4, "D")

    print("KERNEL_OK")
</pallas_src>

<mosaic_0001>
module attributes {stable_mosaic.version = 11 : i64} {
  func.func @_fused_kernel(%arg0: i32, %arg1: memref<1x8x128xbf16, #tpu.memory_space<vmem>>, %arg2: memref<16x8xbf16, #tpu.memory_space<vmem>>, %arg3: memref<16x5xf32, #tpu.memory_space<vmem>>, %arg4: memref<32x16xf32, #tpu.memory_space<vmem>>, %arg5: memref<32x1xf32, #tpu.memory_space<vmem>>, %arg6: memref<16x32xf32, #tpu.memory_space<vmem>>, %arg7: memref<16x16xbf16, #tpu.memory_space<vmem>>, %arg8: memref<16x4xf32, #tpu.memory_space<vmem>>, %arg9: memref<1x16x96xf32, #tpu.memory_space<vmem>>) attributes {dimension_semantics = [#tpu.dimension_semantics<parallel>], iteration_bounds = array<i64: 2>, scalar_prefetch = 0 : i64, scratch_operands = 0 : i64, tpu.core_type = #tpu.core_type<tc>, window_params = [{transform_indices = @transform_0, window_bounds = array<i64: 1, 8, 128>}, {pipeline_mode = #tpu.pipeline_mode<synchronous>, transform_indices = @transform_1, window_bounds = array<i64: 16, 8>}, {pipeline_mode = #tpu.pipeline_mode<synchronous>, transform_indices = @transform_2, window_bounds = array<i64: 16, 5>}, {pipeline_mode = #tpu.pipeline_mode<synchronous>, transform_indices = @transform_3, window_bounds = array<i64: 32, 16>}, {pipeline_mode = #tpu.pipeline_mode<synchronous>, transform_indices = @transform_4, window_bounds = array<i64: 32, 1>}, {pipeline_mode = #tpu.pipeline_mode<synchronous>, transform_indices = @transform_5, window_bounds = array<i64: 16, 32>}, {pipeline_mode = #tpu.pipeline_mode<synchronous>, transform_indices = @transform_6, window_bounds = array<i64: 16, 16>}, {pipeline_mode = #tpu.pipeline_mode<synchronous>, transform_indices = @transform_7, window_bounds = array<i64: 16, 4>}, {transform_indices = @transform_8, window_bounds = array<i64: 1, 16, 96>}]} {
    %c0 = arith.constant 0 : index
    %c0_0 = arith.constant 0 : index
    %c0_1 = arith.constant 0 : index
    %0 = vector.load %arg1[%c0, %c0_0, %c0_1] : memref<1x8x128xbf16, #tpu.memory_space<vmem>>, vector<1x8x128xbf16>
    %1 = vector.shape_cast %0 : vector<1x8x128xbf16> to vector<8x128xbf16>
    %c0_2 = arith.constant 0 : index
    %c0_3 = arith.constant 0 : index
    %2 = vector.load %arg8[%c0_2, %c0_3] : memref<16x4xf32, #tpu.memory_space<vmem>>, vector<16x4xf32>
    %3 = vector.extract_strided_slice %2 {offsets = [0, 0], sizes = [16, 1], strides = [1, 1]} : vector<16x4xf32> to vector<16x1xf32>
    %4 = vector.extract_strided_slice %2 {offsets = [0, 1], sizes = [16, 1], strides = [1, 1]} : vector<16x4xf32> to vector<16x1xf32>
    %5 = vector.extract_strided_slice %2 {offsets = [0, 2], sizes = [16, 1], strides = [1, 1]} : vector<16x4xf32> to vector<16x1xf32>
    %6 = vector.extract_strided_slice %2 {offsets = [0, 3], sizes = [16, 1], strides = [1, 1]} : vector<16x4xf32> to vector<16x1xf32>
    %7 = tpu.iota {dimensions = array<i32: 1>} : vector<1x128xi32>
    %c0_4 = arith.constant 0 : index
    %c0_5 = arith.constant 0 : index
    %8 = vector.load %arg2[%c0_4, %c0_5] : memref<16x8xbf16, #tpu.memory_space<vmem>>, vector<16x8xbf16>
    %cst = arith.constant dense<0.000000e+00> : vector<16x128xf32>
    %9 = tpu.matmul %8, %1, %cst {dimension_numbers = #tpu.dot_dimension_numbers<[1], [0], [0], [1], [0, 0, 1, 1], [], []>} : vector<16x8xbf16>, vector<8x128xbf16>, vector<16x128xf32> -> vector<16x128xf32>
    %10 = vector.broadcast %3 : vector<16x1xf32> to vector<16x128xf32>
    %11 = arith.addf %9, %10 : vector<16x128xf32>
    %cst_6 = arith.constant 1.702000e+00 : f32
    %12 = vector.broadcast %cst_6 : f32 to vector<16x128xf32>
    %13 = arith.mulf %12, %11 : vector<16x128xf32>
    %14 = arith.negf %13 : vector<16x128xf32>
    %15 = math.exp %14 : vector<16x128xf32>
    %cst_7 = arith.constant 1.000000e+00 : f32
    %16 = vector.broadcast %cst_7 : f32 to vector<16x128xf32>
    %17 = arith.addf %16, %15 : vector<16x128xf32>
    %18 = arith.divf %16, %17 : vector<16x128xf32>
    %19 = arith.mulf %11, %18 : vector<16x128xf32>
    %c-2_i32 = arith.constant -2 : i32
    %20 = vector.broadcast %c-2_i32 : i32 to vector<1x128xi32>
    %21 = arith.addi %7, %20 : vector<1x128xi32>
    %c0_i32 = arith.constant 0 : i32
    %22 = vector.broadcast %c0_i32 : i32 to vector<1x128xi32>
    %23 = arith.cmpi sge, %21, %22 : vector<1x128xi32>
    %c-2_i32_8 = arith.constant -2 : i32
    %24 = vector.broadcast %c-2_i32_8 : i32 to vector<1x128xi32>
    %25 = arith.addi %7, %24 : vector<1x128xi32>
    %c96_i32 = arith.constant 96 : i32
    %26 = vector.broadcast %c96_i32 : i32 to vector<1x128xi32>
    %27 = arith.cmpi slt, %25, %26 : vector<1x128xi32>
    %28 = arith.andi %23, %27 : vector<1x128xi1>
    %29 = arith.extui %28 : vector<1x128xi1> to vector<1x128xi32>
    %30 = arith.sitofp %29 : vector<1x128xi32> to vector<1x128xf32>
    %c-1_i32 = arith.constant -1 : i32
    %31 = vector.broadcast %c-1_i32 : i32 to vector<1x128xi32>
    %32 = arith.addi %7, %31 : vector<1x128xi32>
    %c0_i32_9 = arith.constant 0 : i32
    %33 = vector.broadcast %c0_i32_9 : i32 to vector<1x128xi32>
    %34 = arith.cmpi sge, %32, %33 : vector<1x128xi32>
    %c-1_i32_10 = arith.constant -1 : i32
    %35 = vector.broadcast %c-1_i32_10 : i32 to vector<1x128xi32>
    %36 = arith.addi %7, %35 : vector<1x128xi32>
    %c96_i32_11 = arith.constant 96 : i32
    %37 = vector.broadcast %c96_i32_11 : i32 to vector<1x128xi32>
    %38 = arith.cmpi slt, %36, %37 : vector<1x128xi32>
    %39 = arith.andi %34, %38 : vector<1x128xi1>
    %40 = arith.extui %39 : vector<1x128xi1> to vector<1x128xi32>
    %41 = arith.sitofp %40 : vector<1x128xi32> to vector<1x128xf32>
    %c0_i32_12 = arith.constant 0 : i32
    %42 = vector.broadcast %c0_i32_12 : i32 to vector<1x128xi32>
    %43 = arith.addi %7, %42 : vector<1x128xi32>
    %c0_i32_13 = arith.constant 0 : i32
    %44 = vector.broadcast %c0_i32_13 : i32 to vector<1x128xi32>
    %45 = arith.cmpi sge, %43, %44 : vector<1x128xi32>
    %c0_i32_14 = arith.constant 0 : i32
    %46 = vector.broadcast %c0_i32_14 : i32 to vector<1x128xi32>
    %47 = arith.addi %7, %46 : vector<1x128xi32>
    %c96_i32_15 = arith.constant 96 : i32
    %48 = vector.broadcast %c96_i32_15 : i32 to vector<1x128xi32>
    %49 = arith.cmpi slt, %47, %48 : vector<1x128xi32>
    %50 = arith.andi %45, %49 : vector<1x128xi1>
    %51 = arith.extui %50 : vector<1x128xi1> to vector<1x128xi32>
    %52 = arith.sitofp %51 : vector<1x128xi32> to vector<1x128xf32>
    %c1_i32 = arith.constant 1 : i32
    %53 = vector.broadcast %c1_i32 : i32 to vector<1x128xi32>
    %54 = arith.addi %7, %53 : vector<1x128xi32>
    %c0_i32_16 = arith.constant 0 : i32
    %55 = vector.broadcast %c0_i32_16 : i32 to vector<1x128xi32>
    %56 = arith.cmpi sge, %54, %55 : vector<1x128xi32>
    %c1_i32_17 = arith.constant 1 : i32
    %57 = vector.broadcast %c1_i32_17 : i32 to vector<1x128xi32>
    %58 = arith.addi %7, %57 : vector<1x128xi32>
    %c96_i32_18 = arith.constant 96 : i32
    %59 = vector.broadcast %c96_i32_18 : i32 to vector<1x128xi32>
    %60 = arith.cmpi slt, %58, %59 : vector<1x128xi32>
    %61 = arith.andi %56, %60 : vector<1x128xi1>
    %62 = arith.extui %61 : vector<1x128xi1> to vector<1x128xi32>
    %63 = arith.sitofp %62 : vector<1x128xi32> to vector<1x128xf32>
    %c2_i32 = arith.constant 2 : i32
    %64 = vector.broadcast %c2_i32 : i32 to vector<1x128xi32>
    %65 = arith.addi %7, %64 : vector<1x128xi32>
    %c0_i32_19 = arith.constant 0 : i32
    %66 = vector.broadcast %c0_i32_19 : i32 to vector<1x128xi32>
    %67 = arith.cmpi sge, %65, %66 : vector<1x128xi32>
    %c2_i32_20 = arith.constant 2 : i32
    %68 = vector.broadcast %c2_i32_20 : i32 to vector<1x128xi32>
    %69 = arith.addi %7, %68 : vector<1x128xi32>
    %c96_i32_21 = arith.constant 96 : i32
    %70 = vector.broadcast %c96_i32_21 : i32 to vector<1x128xi32>
    %71 = arith.cmpi slt, %69, %70 : vector<1x128xi32>
    %72 = arith.andi %67, %71 : vector<1x128xi1>
    %73 = arith.extui %72 : vector<1x128xi1> to vector<1x128xi32>
    %74 = arith.sitofp %73 : vector<1x128xi32> to vector<1x128xf32>
    %c0_22 = arith.constant 0 : index
    %c0_23 = arith.constant 0 : index
    %75 = vector.load %arg3[%c0_22, %c0_23] : memref<16x5xf32, #tpu.memory_space<vmem>>, vector<16x5xf32>
    %cst_24 = arith.constant 0.000000e+00 : f32
    %76 = vector.broadcast %cst_24 : f32 to vector<16x128xf32>
    %c2_i32_25 = arith.constant 2 : i32
    %77 = tpu.dynamic_rotate %19 by %c2_i32_25 dim 1 : vector<16x128xf32>, i32 -> vector<16x128xf32>
    %78 = vector.broadcast %30 : vector<1x128xf32> to vector<16x128xf32>
    %79 = arith.mulf %77, %78 : vector<16x128xf32>
    %80 = vector.extract_strided_slice %75 {offsets = [0, 0], sizes = [16, 1], strides = [1, 1]} : vector<16x5xf32> to vector<16x1xf32>
    %81 = vector.broadcast %80 : vector<16x1xf32> to vector<16x128xf32>
    %82 = arith.mulf %81, %79 : vector<16x128xf32>
    %83 = arith.addf %76, %82 : vector<16x128xf32>
    %c1_i32_26 = arith.constant 1 : i32
    %84 = tpu.dynamic_rotate %19 by %c1_i32_26 dim 1 : vector<16x128xf32>, i32 -> vector<16x128xf32>
    %85 = vector.broadcast %41 : vector<1x128xf32> to vector<16x128xf32>
    %86 = arith.mulf %84, %85 : vector<16x128xf32>
    %87 = vector.extract_strided_slice %75 {offsets = [0, 1], sizes = [16, 1], strides = [1, 1]} : vector<16x5xf32> to vector<16x1xf32>
    %88 = vector.broadcast %87 : vector<16x1xf32> to vector<16x128xf32>
    %89 = arith.mulf %88, %86 : vector<16x128xf32>
    %90 = arith.addf %83, %89 : vector<16x128xf32>
    %91 = vector.broadcast %52 : vector<1x128xf32> to vector<16x128xf32>
    %92 = arith.mulf %19, %91 : vector<16x128xf32>
    %93 = vector.extract_strided_slice %75 {offsets = [0, 2], sizes = [16, 1], strides = [1, 1]} : vector<16x5xf32> to vector<16x1xf32>
    %94 = vector.broadcast %93 : vector<16x1xf32> to vector<16x128xf32>
    %95 = arith.mulf %94, %92 : vector<16x128xf32>
    %96 = arith.addf %90, %95 : vector<16x128xf32>
    %c127_i32 = arith.constant 127 : i32
    %97 = tpu.dynamic_rotate %19 by %c127_i32 dim 1 : vector<16x128xf32>, i32 -> vector<16x128xf32>
    %98 = vector.broadcast %63 : vector<1x128xf32> to vector<16x128xf32>
    %99 = arith.mulf %97, %98 : vector<16x128xf32>
    %100 = vector.extract_strided_slice %75 {offsets = [0, 3], sizes = [16, 1], strides = [1, 1]} : vector<16x5xf32> to vector<16x1xf32>
    %101 = vector.broadcast %100 : vector<16x1xf32> to vector<16x128xf32>
    %102 = arith.mulf %101, %99 : vector<16x128xf32>
    %103 = arith.addf %96, %102 : vector<16x128xf32>
    %c126_i32 = arith.constant 126 : i32
    %104 = tpu.dynamic_rotate %19 by %c126_i32 dim 1 : vector<16x128xf32>, i32 -> vector<16x128xf32>
    %105 = vector.broadcast %74 : vector<1x128xf32> to vector<16x128xf32>
    %106 = arith.mulf %104, %105 : vector<16x128xf32>
    %107 = vector.extract_strided_slice %75 {offsets = [0, 4], sizes = [16, 1], strides = [1, 1]} : vector<16x5xf32> to vector<16x1xf32>
    %108 = vector.broadcast %107 : vector<16x1xf32> to vector<16x128xf32>
    %109 = arith.mulf %108, %106 : vector<16x128xf32>
    %110 = arith.addf %103, %109 : vector<16x128xf32>
    %111 = vector.broadcast %4 : vector<16x1xf32> to vector<16x128xf32>
    %112 = arith.addf %110, %111 : vector<16x128xf32>
    %cst_27 = arith.constant 1.702000e+00 : f32
    %113 = vector.broadcast %cst_27 : f32 to vector<16x128xf32>
    %114 = arith.mulf %113, %112 : vector<16x128xf32>
    %115 = arith.negf %114 : vector<16x128xf32>
    %116 = math.exp %115 : vector<16x128xf32>
    %cst_28 = arith.constant 1.000000e+00 : f32
    %117 = vector.broadcast %cst_28 : f32 to vector<16x128xf32>
    %118 = arith.addf %117, %116 : vector<16x128xf32>
    %119 = arith.divf %117, %118 : vector<16x128xf32>
    %120 = arith.mulf %112, %119 : vector<16x128xf32>
    %c96_i32_29 = arith.constant 96 : i32
    %121 = vector.broadcast %c96_i32_29 : i32 to vector<1x128xi32>
    %122 = arith.cmpi slt, %7, %121 : vector<1x128xi32>
    %123 = arith.extui %122 : vector<1x128xi1> to vector<1x128xi32>
    %124 = arith.sitofp %123 : vector<1x128xi32> to vector<1x128xf32>
    %125 = vector.broadcast %124 : vector<1x128xf32> to vector<16x128xf32>
    %126 = arith.mulf %120, %125 : vector<16x128xf32>
    %cst_30 = arith.constant dense<0.000000e+00> : vector<16xf32>
    %127 = vector.multi_reduction <add>, %126, %cst_30 [1] : vector<16x128xf32> to vector<16xf32>
    %128 = vector.shape_cast %127 : vector<16xf32> to vector<16x1xf32>
    %cst_31 = arith.constant 0.010416667 : f32
    %129 = vector.broadcast %cst_31 : f32 to vector<16x1xf32>
    %130 = arith.mulf %128, %129 : vector<16x1xf32>
    %c0_32 = arith.constant 0 : index
    %c0_33 = arith.constant 0 : index
    %131 = vector.load %arg4[%c0_32, %c0_33] : memref<32x16xf32, #tpu.memory_space<vmem>>, vector<32x16xf32>
    %cst_34 = arith.constant dense<0.000000e+00> : vector<32x1xf32>
    %132 = tpu.matmul %131, %130, %cst_34 {dimension_numbers = #tpu.dot_dimension_numbers<[1], [0], [0], [1], [0, 0, 1, 1], [], []>} : vector<32x16xf32>, vector<16x1xf32>, vector<32x1xf32> -> vector<32x1xf32>
    %c0_35 = arith.constant 0 : index
    %c0_36 = arith.constant 0 : index
    %133 = vector.load %arg5[%c0_35, %c0_36] : memref<32x1xf32, #tpu.memory_space<vmem>>, vector<32x1xf32>
    %134 = arith.addf %132, %133 : vector<32x1xf32>
    %cst_37 = arith.constant 1.702000e+00 : f32
    %135 = vector.broadcast %cst_37 : f32 to vector<32x1xf32>
    %136 = arith.mulf %135, %134 : vector<32x1xf32>
    %137 = arith.negf %136 : vector<32x1xf32>
    %138 = math.exp %137 : vector<32x1xf32>
    %cst_38 = arith.constant 1.000000e+00 : f32
    %139 = vector.broadcast %cst_38 : f32 to vector<32x1xf32>
    %140 = arith.addf %139, %138 : vector<32x1xf32>
    %141 = arith.divf %139, %140 : vector<32x1xf32>
    %142 = arith.mulf %134, %141 : vector<32x1xf32>
    %c0_39 = arith.constant 0 : index
    %c0_40 = arith.constant 0 : index
    %143 = vector.load %arg6[%c0_39, %c0_40] : memref<16x32xf32, #tpu.memory_space<vmem>>, vector<16x32xf32>
    %cst_41 = arith.constant dense<0.000000e+00> : vector<16x1xf32>
    %144 = tpu.matmul %143, %142, %cst_41 {dimension_numbers = #tpu.dot_dimension_numbers<[1], [0], [0], [1], [0, 0, 1, 1], [], []>} : vector<16x32xf32>, vector<32x1xf32>, vector<16x1xf32> -> vector<16x1xf32>
    %145 = arith.addf %144, %6 : vector<16x1xf32>
    %146 = arith.negf %145 : vector<16x1xf32>
    %147 = math.exp %146 : vector<16x1xf32>
    %cst_42 = arith.constant 1.000000e+00 : f32
    %148 = vector.broadcast %cst_42 : f32 to vector<16x1xf32>
    %149 = arith.addf %148, %147 : vector<16x1xf32>
    %150 = arith.divf %148, %149 : vector<16x1xf32>
    %151 = vector.broadcast %150 : vector<16x1xf32> to vector<16x128xf32>
    %152 = arith.mulf %126, %151 : vector<16x128xf32>
    %c0_43 = arith.constant 0 : index
    %c0_44 = arith.constant 0 : index
    %153 = vector.load %arg7[%c0_43, %c0_44] : memref<16x16xbf16, #tpu.memory_space<vmem>>, vector<16x16xbf16>
    %154 = arith.truncf %152 : vector<16x128xf32> to vector<16x128xbf16>
    %cst_45 = arith.constant dense<0.000000e+00> : vector<16x128xf32>
    %155 = tpu.matmul %153, %154, %cst_45 {dimension_numbers = #tpu.dot_dimension_numbers<[1], [0], [0], [1], [0, 0, 1, 1], [], []>} : vector<16x16xbf16>, vector<16x128xbf16>, vector<16x128xf32> -> vector<16x128xf32>
    %156 = vector.broadcast %5 : vector<16x1xf32> to vector<16x128xf32>
    %157 = arith.addf %155, %156 : vector<16x128xf32>
    %cst_46 = arith.constant 1.702000e+00 : f32
    %158 = vector.broadcast %cst_46 : f32 to vector<16x128xf32>
    %159 = arith.mulf %158, %157 : vector<16x128xf32>
    %160 = arith.negf %159 : vector<16x128xf32>
    %161 = math.exp %160 : vector<16x128xf32>
    %cst_47 = arith.constant 1.000000e+00 : f32
    %162 = vector.broadcast %cst_47 : f32 to vector<16x128xf32>
    %163 = arith.addf %162, %161 : vector<16x128xf32>
    %164 = arith.divf %162, %163 : vector<16x128xf32>
    %165 = arith.mulf %157, %164 : vector<16x128xf32>
    %166 = vector.extract_strided_slice %165 {offsets = [0, 0], sizes = [16, 96], strides = [1, 1]} : vector<16x128xf32> to vector<16x96xf32>
    %c0_48 = arith.constant 0 : index
    %c0_49 = arith.constant 0 : index
    %c0_50 = arith.constant 0 : index
    %167 = vector.load %arg9[%c0_48, %c0_49, %c0_50] : memref<1x16x96xf32, #tpu.memory_space<vmem>>, vector<1x16x96xf32>
    %168 = vector.shape_cast %167 : vector<1x16x96xf32> to vector<16x96xf32>
    %169 = vector.shape_cast %166 : vector<16x96xf32> to vector<1x16x96xf32>
    tpu.vector_store %arg9[%c0_48, %c0_49, %c0_50], %169 {strides = array<i32>} : memref<1x16x96xf32, #tpu.memory_space<vmem>>, vector<1x16x96xf32>,
    return
  }
  func.func @transform_0(%arg0: i32) -> (i32, i32, i32) {
    %c0_i32 = arith.constant 0 : i32
    %c0_i32_0 = arith.constant 0 : i32
    %c0_i32_1 = arith.constant 0 : i32
    return %arg0, %c0_i32, %c0_i32_0 : i32, i32, i32
  }
  func.func @transform_1(%arg0: i32) -> (i32, i32) {
    %c0_i32 = arith.constant 0 : i32
    %c0_i32_0 = arith.constant 0 : i32
    %c0_i32_1 = arith.constant 0 : i32
    return %c0_i32, %c0_i32_0 : i32, i32
  }
  func.func @transform_2(%arg0: i32) -> (i32, i32) {
    %c0_i32 = arith.constant 0 : i32
    %c0_i32_0 = arith.constant 0 : i32
    %c0_i32_1 = arith.constant 0 : i32
    return %c0_i32, %c0_i32_0 : i32, i32
  }
  func.func @transform_3(%arg0: i32) -> (i32, i32) {
    %c0_i32 = arith.constant 0 : i32
    %c0_i32_0 = arith.constant 0 : i32
    %c0_i32_1 = arith.constant 0 : i32
    return %c0_i32, %c0_i32_0 : i32, i32
  }
  func.func @transform_4(%arg0: i32) -> (i32, i32) {
    %c0_i32 = arith.constant 0 : i32
    %c0_i32_0 = arith.constant 0 : i32
    %c0_i32_1 = arith.constant 0 : i32
    return %c0_i32, %c0_i32_0 : i32, i32
  }
  func.func @transform_5(%arg0: i32) -> (i32, i32) {
    %c0_i32 = arith.constant 0 : i32
    %c0_i32_0 = arith.constant 0 : i32
    %c0_i32_1 = arith.constant 0 : i32
    return %c0_i32, %c0_i32_0 : i32, i32
  }
  func.func @transform_6(%arg0: i32) -> (i32, i32) {
    %c0_i32 = arith.constant 0 : i32
    %c0_i32_0 = arith.constant 0 : i32
    %c0_i32_1 = arith.constant 0 : i32
    return %c0_i32, %c0_i32_0 : i32, i32
  }
  func.func @transform_7(%arg0: i32) -> (i32, i32) {
    %c0_i32 = arith.constant 0 : i32
    %c0_i32_0 = arith.constant 0 : i32
    %c0_i32_1 = arith.constant 0 : i32
    return %c0_i32, %c0_i32_0 : i32, i32
  }
  func.func @transform_8(%arg0: i32) -> (i32, i32, i32) {
    %c0_i32 = arith.constant 0 : i32
    %c0_i32_0 = arith.constant 0 : i32
    %c0_i32_1 = arith.constant 0 : i32
    return %arg0, %c0_i32, %c0_i32_0 : i32, i32, i32
  }
}

</mosaic_0001>

<bundles_post_ra>
// kernel: tpu_custom_call.1
= control target key start
LH: loop header
LB: loop body
LE: loop exit
PB: predicated region body
PF: predicated region fallthrough
CT: control target
= control target key end

     0   :  { %13 = vsyncpa [#allocation3], 0  ;;  %s1481_s0 = inlined_call_operand.vmem [shape: bf16[2,8,128], index: 0, kind: input, shape index: {}]   ;;  %s1482_s1 = inlined_call_operand.vmem [shape: bf16[16,8], index: 1, kind: input, shape index: {}]   ;;  %s1483_s2 = inlined_call_operand.vmem [shape: f32[16,5], index: 2, kind: input, shape index: {}]   ;;  %s1484_s3 = inlined_call_operand.vmem [shape: f32[32,16], index: 3, kind: input, shape index: {}]   ;;  %s1485_s4 = inlined_call_operand.vmem [shape: f32[32,1], index: 4, kind: input, shape index: {}]   ;;  %s1486_s5 = inlined_call_operand.vmem [shape: f32[16,32], index: 5, kind: input, shape index: {}]   ;;  %s1487_s6 = inlined_call_operand.vmem [shape: bf16[16,16], index: 6, kind: input, shape index: {}]   ;;  %s1488_s7 = inlined_call_operand.vmem [shape: f32[16,4], index: 7, kind: input, shape index: {}]   ;;  %s1489_s8 = inlined_call_operand.hbm [shape: f32[2,16,96], index: 8, kind: output, shape index: {}]  }
   0x1   :  { %15 = vsyncpa [#allocation3 + $0x1], 0  ;;  %s1279_s27 = smov 0   ;;  %s1281_s28 = smov 0  }
   0x2   :  { %s1283_s29 = smov 0   ;;  %s1285_s30 = smov 0  }
   0x3 LB: > { %s1300_s9 = sadd.s32 4294967295, %s1217_s30   ;;  %s951_s10 = sadd.s32 4294967294, %s1217_s30   ;;  %s1217_s30 = sphi %s1285_s30, %s1495_s30   ;;  %s1213_s29 = sphi %s1283_s29, %s1494_s29   ;;  %s1209_s28 = sphi %s1281_s28, %s1493_s28   ;;  %s1205_s27 = sphi %s1279_s27, %s1492_s27  }
   0x4   : > { %s1304_s11 = sadd.s32 1, %s1217_s30   ;;  %s201_s12 = sadd.s32 1, %s1213_s29 }
   0x5   : > { %s198_s13 = ssub.s32 %s1217_s30, %s1304_s11  ;;  %p211_p0 = scmp.ne.s32.totalorder %s1213_s29, %s1209_s28 }
   0x6   : > { %p199_p1 = scmp.eq.s32.totalorder %s198_s13, 0  ;;  %p212_p2 = scmp.eq.s32.totalorder %s1300_s9, 1 }
   0x7   : > { %p217_p3 = scmp.ne.s32.totalorder %s1209_s28, %s1205_s27  ;;  %p218_p4 = scmp.eq.s32.totalorder %s951_s10, 1 }
   0x8   : > { %s1315_s14 = scalar_select %p199_p1, %s1213_s29, %s201_s12  }
   0x9   : > { %p1317_p5 = por %p212_p2, %p211_p0  ;;  %p1321_p6 = por %p218_p4, %p217_p3 }
   0xa   : > { %p954_p7 = scmp.ge.s32.totalorder %s1217_s30, 1  ;;  %p264_p8 = scmp.lt.s32.totalorder %s1217_s30, 3 }
   0xc   : > { %p265_p9 = pnand %p954_p7, %p264_p8 }
   0xd   : > { %p297_p10 = scmp.lt.s32.totalorder (!%p265_p9), %s1300_s9, 1  ;;  %s1227_s20 = smov (!%p265_p9), 2  }
   0xe   : > { %268 = sbr.rel (%p265_p9) target bundleno = 1445 (0x5a5), region = 52  ;;  %s1228_s21 = smov (!%p265_p9), 127  }
   0xf   : > { %s990_s24 = sshll.u32 (!%p265_p9), %s1300_s9, 8 }
  0x13   : > { %v1219_v0 = vmov 0.0   ;;  %vm1220_vm0 = vmmov 0   ;;  %v1334_v1 = vld [vmem:[%s1488_s7 + $0x8] sm:$0xff]  ;;  %s298_s19 = scalar_select %p297_p10, %s1300_s9, 1  ;;  %v1221_v2 = vmov 0   ;;  %vm328_vm1 = vcmask 1043456  }
  0x14   : > { %1007 = vmatprep.subr.bf16.mxu0 %v1219_v0  ;;  %1009 = vmatprep.mubr.msk.bf16.mxu0 %vm1220_vm0, %v1219_v0  ;;  %v419_v3 = vld [vmem:[%s1483_s2 + $0x8] sm:$0xff]  ;;  %v1346_v4 = vld [vmem:[%s1488_s7] sm:$0xff]  ;;  %vm324_vm2 = vcmask 64512   ;;  %v1222_v9 = vmov 2   ;;  %v1223_v10 = vmov 1   ;;  %v1224_v11 = vmov 3  }
  0x15   : > { %1093 = vset.pattern.permute.xlu0 %v1221_v2  ;;  %1094 = vset.pattern.permute.xlu1 %v1221_v2  ;;  %s956_s22 = sshll.u32 %s298_s19, 2  ;;  %v1107_v7 = vld [vmem:[%s1482_s1] sm:$0xff]   ;;  %v1225_v12 = vmov 4   ;;  %s1226_s19 = smov 1   ;;  %v305_v39 = vlaneseq  ;;  %vm552_vm12 = vcmask 130048   ;;  %vm690_vm13 = vcmask 261120  }
  0x16   : > { %316 = vperm.xlu0 %1093, %v1334_v1   ;;  %433 = vperm.xlu1 %1094, %v419_v3   ;;  %s300_s10 = scalar_lea.vmem %s1481_s0, %s956_s22  ;;  %v418_v8 = vld [vmem:[%s1483_s2] sm:$0xff]  ;;  %s1229_s22 = smov 126   ;;  %vm872_vm14 = vcmask 785408  }
  0x17   : > { %v302_v5 = vld [vmem:[%s300_s10] sm:$0xf]  ;;  %v306_v42 = vand.u32 127, %v305_v39  ;;  %s1437_s10 = scalar_lea.hbm %s1489_s8, %s990_s24  ;;  %s1231_s9 = smov [#allocation2]  }
  0x18   : > { %v330_v6 = vsel %vm328_vm1, %v302_v5, 0  ;;  %s1161_s17 = sshll.u32 %s1231_s9, 4  ;;  %s1162_s17 = int_to_ptr.vmem [resolvable:$false] %s1161_s17 }
  0x19   : > { %1008 = vmatpush3.bf16.msra.mxu0 %v330_v6  ;;  %v389_v43 = vadd.s32 4294967294, %v306_v42  ;;  %v395_v46 = vadd.s32 4294967295, %v306_v42  ;;  %vm402_vm9 = vcmp.lt.s32.totalorder %v306_v42, 96  ;;  %v406_v50 = vadd.s32 1, %v306_v42  ;;  %s1163_s18 = scalar_lea.vmem %s1162_s17, 512 }
  0x1a   : > { %311 = vperm.xlu0 %1093, %v1346_v4   ;;  %1095 = vset.pattern.permute.xlu1 %v1223_v10  ;;  %v963_v55 = vsel %vm402_vm9, 1.0, %v1219_v0  ;;  %v412_v58 = vadd.s32 2, %v306_v42 }
  0x1b   : > { %451 = vperm.xlu1 %1095, %v419_v3   ;;  %vm390_vm3 = vcmp.ge.s32.totalorder %v389_v43, 0  ;;  %vm391_vm4 = vcmp.lt.s32.totalorder %v389_v43, 96  ;;  %vm396_vm5 = vcmp.ge.s32.totalorder %v395_v46, 0  ;;  %vm397_vm6 = vcmp.lt.s32.totalorder %v395_v46, 96 }
  0x1c   : > { %1010 = vmatmul.mubr.msk.bf16.vlgmr.msra.gmra.mxu0 %vm324_vm2, %v1107_v7  ;;  %vm392_vm7 = vmand %vm390_vm3, %vm391_vm4  ;;  %vm408_vm10 = vcmp.lt.s32.totalorder %v406_v50, 96  ;;  %vm414_vm11 = vcmp.lt.s32.totalorder %v412_v58, 96 }
  0x1d   : > { %vm398_vm8 = vmand %vm396_vm5, %vm397_vm6  ;;  %v961_v51 = vsel %vm392_vm7, 1.0, %v1219_v0 }
  0x1e   : > { %428 = vperm.xlu0 %1093, %v418_v8   ;;  %v962_v52 = vsel %vm398_vm8, 1.0, %v1219_v0 }
  0x1f   : > { %447 = vperm.xlu1 %1095, %v418_v8  }
  0x22   : > { %1096 = vset.pattern.permute.xlu0 %v1222_v9 }
  0x23   : > { %465 = vperm.xlu0 %1096, %v419_v3   ;;  %1097 = vset.pattern.permute.xlu1 %v1224_v11 }
  0x24   : > { %483 = vperm.xlu1 %1097, %v419_v3  }
  0x27   : > { %461 = vperm.xlu0 %1096, %v418_v8  }
  0x28   : > { %1099 = vset.pattern.permute.xlu1 %v1225_v12 }
  0x29   : > { %501 = vperm.xlu1 %1099, %v419_v3  }
  0x2b   : > { %1098 = vset.pattern.permute.xlu0 %v1224_v11 }
  0x2c   : > { %479 = vperm.xlu0 %1098, %v418_v8  }
  0x2d   : > { %1102 = vset.pattern.permute.xlu1 %v1223_v10 }
  0x30   : > { %1100 = vset.pattern.permute.xlu0 %v1225_v12 }
  0x91   : > { %v317_v13 = vpop.permute.xlu0 %316  ;;  %v434_v33 = vpop.permute.xlu1 %433 }
  0x95   : > { %v312_v14 = vpop.permute.xlu0 %311 }
  0x96   : > { %v452_v34 = vpop.permute.xlu1 %451 }
  0x99   : > { %v429_v38 = vpop.permute.xlu0 %428 }
  0x9a   : > { %v448_v35 = vpop.permute.xlu1 %447 }
  0x9e   : > { %v466_v40 = vpop.permute.xlu0 %465 }
  0x9f   : > { %v484_v36 = vpop.permute.xlu1 %483 }
  0xa2   : > { %v462_v45 = vpop.permute.xlu0 %461 }
  0xa4   : > { %v502_v37 = vpop.permute.xlu1 %501 }
  0xa7   : > { %v480_v48 = vpop.permute.xlu0 %479 }
  0xdc   : > { %v366_v15 = vpop.f32.mrf.mxu0 }
  0xdd   : > { %v367_v16 = vadd.f32 %v366_v15, %v312_v14  ;;  %v965_v14 = vsel %vm414_vm11, 1.0, %v1219_v0 }
  0xde   : > { %v1011_v17 = vpop.f32.mrf.mxu0 }
  0xdf   : > { %v959_v18 = vmul.f32 -1.702, %v367_v16 }
  0xe0   : > { %v369_v19 = vpop.f32.mrf.mxu0 }
  0xe1   : > { %v377_v20 = vmul.f32 1.442695, %v959_v18  ;;  %v370_v21 = vadd.f32 %v369_v19, %v317_v13 }
  0xe2   : > { %v1012_v22 = vpop.f32.mrf.mxu0 }
  0xe3   : > { %1109 = vpow2.f32 %v377_v20  ;;  %v960_v23 = vmul.f32 -1.702, %v370_v21 }
  0xe5   : > { %v379_v24 = vmul.f32 1.442695, %v960_v23 }
  0xe7   : > { %1111 = vpow2.f32 %v379_v24 }
  0xf0   : > { %v1110_v25 = vpop.eup %1109 }
  0xf1   : > { %v381_v26 = vadd.f32 1.0, %v1110_v25 }
  0xf3   : > { %1113 = vrcp.f32 %v381_v26 }
  0xf4   : > { %v1112_v27 = vpop.eup %1111 }
  0xf5   : > { %v382_v28 = vadd.f32 1.0, %v1112_v27 }
  0xf7   : > { %1115 = vrcp.f32 %v382_v28 }
 0x100   : > { %v1114_v29 = vpop.eup %1113 }
 0x101   : > { %v1359_v30 = vmul.f32 %v1114_v29, %v367_v16 }
 0x103   : > { %440 = vrot.lane.b32.xlu1 %v1359_v30, %s1226_s19  ;;  %420 = vrot.lane.b32.xlu0 %v1359_v30, %s1227_s20  ;;  %v458_v13 = vmul.f32 %v963_v55, %v1359_v30 }
 0x104   : > { %v1116_v31 = vpop.eup %1115 }
 0x105   : > { %v388_v32 = vmul.f32 %v1116_v31, %v370_v21  ;;  %v468_v22 = vmul.f32 %v462_v45, %v458_v13 }
 0x107   : > { %472 = vrot.lane.b32.xlu1 %v1359_v30, %s1228_s21  ;;  %497 = vperm.xlu0 %1100, %v418_v8   ;;  %v459_v57 = vmul.f32 %v963_v55, %v388_v32 }
 0x109   : > { %v469_v5 = vmul.f32 %v466_v40, %v459_v57  ;;  %v549_v57 = vld [vmem:[%s1485_s4 + $0x8] sm:$0xff] }
 0x10b   : > { %490 = vrot.lane.b32.xlu1 %v1359_v30, %s1229_s22  ;;  %1101 = vset.pattern.permute.xlu0 %v1223_v10 }
 0x10c   : > { %513 = vperm.xlu0 %1101, %v1334_v1  }
 0x10f   : > { %422 = vrot.lane.b32.xlu1 %v388_v32, %s1227_s20  ;;  %s1230_s20 = smov 125  }
 0x110   : > { %1103 = vset.pattern.permute.xlu0 %v1221_v2 }
 0x113   : > { %442 = vrot.lane.b32.xlu1 %v388_v32, %s1226_s19 }
 0x117   : > { %474 = vrot.lane.b32.xlu1 %v388_v32, %s1228_s21 }
 0x11b   : > { %492 = vrot.lane.b32.xlu1 %v388_v32, %s1229_s22 }
 0x11f   : > { %509 = vperm.xlu1 %1102, %v1346_v4  }
 0x123   : > { %1104 = vset.pattern.permute.xlu1 %v1221_v2  ;;  %v964_v2 = vsel %vm408_vm10, 1.0, %v1219_v0 }
 0x175   : > { %v441_v41 = vpop.permute.xlu1 %440  ;;  %v421_v53 = vpop.permute.xlu0 %420 }
 0x176   : > { %v444_v60 = vmul.f32 %v962_v52, %v441_v41  ;;  %v424_v61 = vmul.f32 %v961_v51, %v421_v53  ;;  %v545_v53 = vld [vmem:[%s1484_s3 + $0x8] sm:$0xff] }
 0x178   : > { %v454_v8 = vmul.f32 %v448_v35, %v444_v60  ;;  %v436_v10 = vmul.f32 %v429_v38, %v424_v61  ;;  %v551_v61 = vld [vmem:[%s1485_s4 + $0x18] sm:$0xff] }
 0x179   : > { %v473_v44 = vpop.permute.xlu1 %472 }
 0x17a   : > { %v456_v18 = vadd.f32 %v454_v8, %v436_v10  ;;  %v476_v19 = vmul.f32 %v964_v2, %v473_v44 }
 0x17c   : > { %v486_v25 = vmul.f32 %v480_v48, %v476_v19  ;;  %v470_v27 = vadd.f32 %v468_v22, %v456_v18  ;;  %v544_v48 = vld [vmem:[%s1484_s3] sm:$0xff] }
 0x17d   : > { %v491_v47 = vpop.permute.xlu1 %490  ;;  %1017 = vmatprep.mubr.msk.f32.mxu1 %vm552_vm12, %v544_v48 }
 0x17e   : > { %v494_v26 = vmul.f32 %v965_v14, %v491_v47  ;;  %v488_v32 = vadd.f32 %v486_v25, %v470_v27 }
 0x181   : > { %v423_v49 = vpop.permute.xlu1 %422 }
 0x182   : > { %v425_v54 = vmul.f32 %v961_v51, %v423_v49  ;;  %v498_v15 = vpop.permute.xlu0 %497 }
 0x183   : > { %v504_v29 = vmul.f32 %v498_v15, %v494_v26 }
 0x184   : > { %v437_v62 = vmul.f32 %v434_v33, %v425_v54  ;;  %v546_v54 = vld [vmem:[%s1484_s3 + $0x10] sm:$0xff] }
 0x185   : > { %v443_v56 = vpop.permute.xlu1 %442  ;;  %v506_v33 = vadd.f32 %v504_v29, %v488_v32 }
 0x186   : > { %v445_v59 = vmul.f32 %v962_v52, %v443_v56  ;;  %v682_v56 = vld [vmem:[%s1486_s5] sm:$0xff] }
 0x187   : > { %v514_v23 = vpop.permute.xlu0 %513  ;;  %1031 = vmatprep.mubr.msk.f32.mxu0 %vm690_vm13, %v682_v56 }
 0x188   : > { %v455_v63 = vmul.f32 %v452_v34, %v445_v59 }
 0x189   : > { %v475_v3 = vpop.permute.xlu1 %474 }
 0x18a   : > { %v457_v6 = vadd.f32 %v455_v63, %v437_v62  ;;  %v477_v7 = vmul.f32 %v964_v2, %v475_v3  ;;  %v550_v3 = vld [vmem:[%s1485_s4 + $0x10] sm:$0xff] }
 0x18c   : > { %v487_v11 = vmul.f32 %v484_v36, %v477_v7  ;;  %v471_v12 = vadd.f32 %v469_v5, %v457_v6 }
 0x18d   : > { %v493_v16 = vpop.permute.xlu1 %492 }
 0x18e   : > { %v495_v17 = vmul.f32 %v965_v14, %v493_v16  ;;  %v489_v21 = vadd.f32 %v487_v11, %v471_v12 }
 0x190   : > { %v505_v20 = vmul.f32 %v502_v37, %v495_v17 }
 0x192   : > { %v507_v24 = vadd.f32 %v505_v20, %v489_v21 }
 0x194   : > { %v517_v28 = vadd.f32 %v514_v23, %v507_v24 }
 0x196   : > { %v967_v31 = vmul.f32 -1.702, %v517_v28 }
 0x198   : > { %v524_v30 = vmul.f32 1.442695, %v967_v31 }
 0x19a   : > { %1117 = vpow2.f32 %v524_v30  ;;  %v510_v34 = vpop.permute.xlu1 %509  ;;  %v683_v30 = vld [vmem:[%s1486_s5 + $0x8] sm:$0xff] }
 0x19b   : > { %v516_v35 = vadd.f32 %v510_v34, %v506_v33 }
 0x19d   : > { %v966_v36 = vmul.f32 -1.702, %v516_v35 }
 0x19f   : > { %v522_v38 = vmul.f32 1.442695, %v966_v36 }
 0x1a1   : > { %1119 = vpow2.f32 %v522_v38 }
 0x1a7   : > { %v1118_v37 = vpop.eup %1117 }
 0x1a8   : > { %v527_v39 = vadd.f32 1.0, %v1118_v37 }
 0x1aa   : > { %1121 = vrcp.f32 %v527_v39 }
 0x1ae   : > { %v1120_v40 = vpop.eup %1119 }
 0x1af   : > { %v526_v41 = vadd.f32 1.0, %v1120_v40 }
 0x1b1   : > { %1123 = vrcp.f32 %v526_v41 }
 0x1b7   : > { %v1122_v42 = vpop.eup %1121 }
 0x1b8   : > { %v533_v43 = vmul.f32 %v1122_v42, %v517_v28 }
 0x1ba   : > { %v1375_v44 = vmul.f32 %v963_v55, %v533_v43 }
 0x1bc   : > { %540 = vadd.xlane.f32.xlu0 %v1375_v44 }
 0x1be   : > { %v1124_v45 = vpop.eup %1123 }
 0x1bf   : > { %v532_v46 = vmul.f32 %v1124_v45, %v516_v35 }
 0x1c1   : > { %v1378_v47 = vmul.f32 %v963_v55, %v532_v46  ;;  %v547_v55 = vld [vmem:[%s1484_s3 + $0x18] sm:$0xff] }
 0x1c3   : > { %538 = vadd.xlane.f32.xlu1 %v1378_v47 }
 0x1d2   : > { %684 = vrot.lane.b32.xlu0 %v1346_v4, %s1230_s20 }
 0x1d4   : > { %686 = vrot.lane.b32.xlu1 %v1334_v1, %s1230_s20  ;;  %s294_s20 = sand.u32 1, %s1209_s28  }
 0x1d5   : > { %s955_s21 = sshll.u32 %s294_s20, 4  ;;  %s1441_s12 = scalar_lea.sflag [#allocation3], %s294_s20 }
 0x1d6   : > { %s296_s22 = scalar_lea.vmem [#allocation2], %s955_s21 }
 0x1d7   : > { %s889_s23 = sshll.u32 %s296_s22, 4  ;;  %s1439_s23 = int_to_ptr.vmem [resolvable:$true] %s889_s23 }
 0x1d8   : > { %s1157_s13 = scalar_lea.vmem %s1439_s23, 256  ;;  %p1164_p0 = scmp.lt.s32.totalorder %s1439_s23, %s1162_s17 }
 0x1d9   : > { %p1158_p11 = scmp.ne.s32.totalorder %s1439_s23, %s1157_s13  ;;  %p1165_p1 = scmp.lt.s32.totalorder %s1163_s18, %s1157_s13 }
 0x1db   : > { %p1159_p12 = pnand %p1158_p11, %p1317_p5  ;;  %p1166_p2 = por %p1165_p1, %p1164_p0 }
 0x1dd   : > { %p1160_p13 = pneg %p1159_p12 }
 0x1df   : > { %p1167_p3 = pnand %p1166_p2, %p1160_p13 }
 0x245   : > { %v541_v49 = vpop.xlane.xlu0 %540 }
 0x246   : > { %v543_v50 = vmul.f32 0.010416667, %v541_v49 }
 0x248   : > { %1013 = vmatprep.subr.mxu1 %v543_v50 }
 0x249   : > { %1014 = vmatpush3.msra.mxu1 %v543_v50  ;;  %v685_v35 = vpop.permute.xlu0 %684 }
 0x24c   : > { %v539_v51 = vpop.xlane.xlu1 %538 }
 0x24d   : > { %v542_v52 = vmul.f32 0.010416667, %v539_v51 }
 0x24f   : > { %1015 = vmatprep.subr.mxu1 %v542_v52 }
 0x250   : > { %1016 = vmatpush3.msra.mxu1 %v542_v52  ;;  %v687_v33 = vpop.permute.xlu1 %686 }
 0x251   : > { %1018 = vmatmul.mubr.msk.f32.vlgmr.msra.gmra.mxu1 %vm552_vm12, %v545_v53  ;;  %1034 = vmatprep.subr.bf16.mxu1 %v1219_v0 }
 0x252   : > { %1020 = vmatprep.mubr.msk.f32.mxu1 %vm552_vm12, %v546_v54  ;;  %v1108_v54 = vld [vmem:[%s1487_s6] sm:$0xff]  }
 0x255   : > { %1021 = vmatmul.mubr.msk.f32.gmra.mxu1 %vm552_vm12, %v547_v55 }
 0x256   : > { %1036 = vmatprep.mubr.msk.bf16.mxu1 %vm1220_vm0, %v1219_v0  ;;  %v548_v0 = vld [vmem:[%s1485_s4] sm:$0xff] }
 0x311   : > { %v1019_v58 = vpop.f32.mrf.mxu1 }
 0x312   : > { %v637_v59 = vadd.f32 %v1019_v58, %v549_v57 }
 0x313   : > { %v631_v60 = vpop.f32.mrf.mxu1 }
 0x314   : > { %v974_v62 = vmul.f32 -1.702, %v637_v59  ;;  %v632_v63 = vadd.f32 %v631_v60, %v548_v0 }
 0x315   : > { %v1022_v2 = vpop.f32.mrf.mxu1 }
 0x316   : > { %v660_v5 = vmul.f32 1.442695, %v974_v62  ;;  %v973_v6 = vmul.f32 -1.702, %v632_v63  ;;  %v647_v7 = vadd.f32 %v1022_v2, %v551_v61 }
 0x317   : > { %v641_v8 = vpop.f32.mrf.mxu1 }
 0x318   : > { %v658_v10 = vmul.f32 1.442695, %v973_v6  ;;  %v976_v11 = vmul.f32 -1.702, %v647_v7  ;;  %v642_v12 = vadd.f32 %v641_v8, %v550_v3  ;;  %1125 = vpow2.f32 %v660_v5 }
 0x31a   : > { %v664_v13 = vmul.f32 1.442695, %v976_v11  ;;  %v975_v14 = vmul.f32 -1.702, %v642_v12  ;;  %1127 = vpow2.f32 %v658_v10 }
 0x31c   : > { %1129 = vpow2.f32 %v664_v13  ;;  %v662_v15 = vmul.f32 1.442695, %v975_v14 }
 0x31e   : > { %1131 = vpow2.f32 %v662_v15 }
 0x325   : > { %v1126_v16 = vpop.eup %1125 }
 0x326   : > { %v667_v19 = vadd.f32 1.0, %v1126_v16 }
 0x327   : > { %v1128_v17 = vpop.eup %1127 }
 0x328   : > { %v666_v22 = vadd.f32 1.0, %v1128_v17 }
 0x329   : > { %v1130_v18 = vpop.eup %1129 }
 0x32a   : > { %v669_v20 = vadd.f32 1.0, %v1130_v18 }
 0x32b   : > { %v1132_v21 = vpop.eup %1131 }
 0x32c   : > { %1133 = vrcp.f32 %v669_v20  ;;  %v668_v23 = vadd.f32 1.0, %v1132_v21 }
 0x32d   : > { %1135 = vrcp.f32 %v667_v19 }
 0x32e   : > { %1137 = vrcp.f32 %v668_v23 }
 0x32f   : > { %1139 = vrcp.f32 %v666_v22 }
 0x339   : > { %v1134_v24 = vpop.eup %1133 }
 0x33a   : > { %v1136_v25 = vpop.eup %1135  ;;  %v681_v26 = vmul.f32 %v1134_v24, %v647_v7 }
 0x33b   : > { %v1138_v27 = vpop.eup %1137  ;;  %v679_v31 = vmul.f32 %v1136_v25, %v637_v59 }
 0x33c   : > { %v680_v28 = vmul.f32 %v1138_v27, %v642_v12  ;;  %1023 = vmatprep.subr.mxu0 %v681_v26  ;;  %v1140_v29 = vpop.eup %1139 }
 0x33d   : > { %1024 = vmatpush3.msra.mxu0 %v681_v26  ;;  %v678_v32 = vmul.f32 %v1140_v29, %v632_v63 }
 0x33e   : > { %1025 = vmatprep.subr.mxu0 %v680_v28 }
 0x33f   : > { %1026 = vmatpush3.msra.mxu0 %v680_v28 }
 0x340   : > { %1027 = vmatprep.subr.mxu0 %v679_v31 }
 0x341   : > { %1028 = vmatpush3.msra.mxu0 %v679_v31 }
 0x342   : > { %1029 = vmatprep.subr.mxu0 %v678_v32 }
 0x343   : > { %1030 = vmatpush3.msra.mxu0 %v678_v32 }
 0x344   : > { %1032 = vmatmul.mubr.msk.f32.vlgmr.msra.gmra.mxu0 %vm690_vm13, %v683_v30 }
 0x404   : > { %v1033_v34 = vpop.f32.mrf.mxu0 }
 0x405   : > { %v769_v36 = vadd.f32 %v1033_v34, %v687_v33 }
 0x406   : > { %v763_v38 = vpop.f32.mrf.mxu0 }
 0x407   : > { %v980_v37 = vmul.f32 -1.442695, %v769_v36  ;;  %v764_v39 = vadd.f32 %v763_v38, %v685_v35 }
 0x409   : > { %1141 = vpow2.f32 %v980_v37  ;;  %v979_v40 = vmul.f32 -1.442695, %v764_v39 }
 0x40b   : > { %1143 = vpow2.f32 %v979_v40 }
 0x416   : > { %v1142_v41 = vpop.eup %1141 }
 0x417   : > { %v779_v42 = vadd.f32 1.0, %v1142_v41 }
 0x418   : > { %v1144_v43 = vpop.eup %1143 }
 0x419   : > { %1145 = vrcp.f32 %v779_v42  ;;  %v778_v45 = vadd.f32 1.0, %v1144_v43 }
 0x41b   : > { %1147 = vrcp.f32 %v778_v45 }
 0x426   : > { %v1146_v46 = vpop.eup %1145 }
 0x427   : > { %791 = vperm.xlu1 %1104, %v1146_v46  }
 0x428   : > { %v1148_v48 = vpop.eup %1147 }
 0x429   : > { %786 = vperm.xlu0 %1103, %v1148_v48  }
 0x42b   : > { %1105 = vset.pattern.permute.xlu1 %v1222_v9 }
 0x42c   : > { %800 = vperm.xlu1 %1105, %v1346_v4  }
 0x42d   : > { %1106 = vset.pattern.permute.xlu0 %v1222_v9 }
 0x42e   : > { %804 = vperm.xlu0 %1106, %v1334_v1  }
 0x4a2   : > { %v792_v49 = vpop.permute.xlu1 %791 }
 0x4a3   : > { %v795_v51 = vmul.f32 %v792_v49, %v1375_v44 }
 0x4a4   : > { %v787_v50 = vpop.permute.xlu0 %786 }
 0x4a5   : > { %v794_v52 = vmul.f32 %v787_v50, %v1378_v47 }
 0x4a7   : > { %v798_v53 = vpack.c.bf16 %v795_v51, %v794_v52  ;;  %v801_v55 = vpop.permute.xlu1 %800 }
 0x4a9   : > { %1035 = vmatpush3.bf16.msra.mxu1 %v798_v53  ;;  %v805_v57 = vpop.permute.xlu0 %804 }
 0x4ac   : > { %1037 = vmatmul.mubr.msk.bf16.vlgmr.msra.gmra.mxu1 %vm552_vm12, %v1108_v54 }
 0x56c   : > { %v849_v4 = vpop.f32.mrf.mxu1 }
 0x56d   : > { %v850_v56 = vadd.f32 %v849_v4, %v801_v55 }
 0x56e   : > { %v1038_v9 = vpop.f32.mrf.mxu1 }
 0x56f   : > { %v983_v1 = vmul.f32 -1.702, %v850_v56 }
 0x570   : > { %v852_v58 = vpop.f32.mrf.mxu1 }
 0x571   : > { %v860_v0 = vmul.f32 1.442695, %v983_v1  ;;  %v853_v44 = vadd.f32 %v852_v58, %v805_v57 }
 0x572   : > { %v1039_v59 = vpop.f32.mrf.mxu1 }
 0x573   : > { %1149 = vpow2.f32 %v860_v0  ;;  %v984_v47 = vmul.f32 -1.702, %v853_v44 }
 0x575   : > { %v862_v60 = vmul.f32 1.442695, %v984_v47 }
 0x577   : > { %1151 = vpow2.f32 %v862_v60 }
 0x580   : > { %v1150_v61 = vpop.eup %1149 }
 0x581   : > { %v864_v62 = vadd.f32 1.0, %v1150_v61 }
 0x583   : > { %1153 = vrcp.f32 %v864_v62 }
 0x584   : > { %v1152_v63 = vpop.eup %1151 }
 0x585   : > { %v865_v2 = vadd.f32 1.0, %v1152_v63 }
 0x587   : > { %1155 = vrcp.f32 %v865_v2 }
 0x590   : > { %v1154_v3 = vpop.eup %1153 }
 0x591   : > { %v870_v5 = vmul.f32 %v1154_v3, %v850_v56 }
 0x593   : > { %873 = vst.msk [vmem:[%s296_s22] sm:$0xff] %vm872_vm14, %v870_v5 }
 0x594   : > { %v1156_v6 = vpop.eup %1155 }
 0x595   : > { %v871_v7 = vmul.f32 %v1156_v6, %v853_v44 }
 0x597   : > { %874 = vst.msk [vmem:[%s296_s22 + $0x8] sm:$0xff] %vm872_vm14, %v871_v7 }
 0x598   : > { %1170 = shalt.err (!%p1167_p3)
}
 0x599   : > { %s1171_s19 = scalar_lea.hbm %s1437_s10, 256  ;;  %s1175_s22 = scalar_lea.hbm %s1489_s8, 512 }
 0x59a   : > { %p1172_p4 = scmp.ne.s32.totalorder %s1437_s10, %s1171_s19  ;;  %p1176_p9 = scmp.lt.s32.totalorder %s1437_s10, %s1489_s8 }
 0x59b   : > { %p1177_p10 = scmp.lt.s32.totalorder %s1175_s22, %s1171_s19 }
 0x59c   : > { %p1173_p7 = pnand %p1172_p4, %p1317_p5 }
 0x59d   : > { %p1178_p11 = por %p1177_p10, %p1176_p9 }
 0x59e   : > { %p1174_p8 = pneg %p1173_p7 }
 0x5a0   : > { %p1179_p12 = pnand %p1178_p11, %p1174_p8 }
 0x5a2   : > { %1182 = shalt.err (!%p1179_p12)
}
 0x5a3   : > { %s1232_s26 = smov 128   ;;  %s1233_s13 = smov 8  }
 0x5a4   : > { %1040 = dma.vmem_to_hbm [thread:$0]  (%p1317_p5), %s1439_s23, 256, %s1437_s10, %s1441_s12, %s1232_s26, %s1232_s26, %s1233_s13  }
 0x5a5 PF: > { %p1046_p13 = scmp.ge.s32.totalorder %s1217_s30, 2  ;;  %s904_s9 = sand.u32 1, %s1205_s27  }
 0x5a6   : > { %s905_s17 = scalar_lea.sflag [#allocation3], %s904_s9 }
 0x5a7   : > { %p1043_p0 = pnand %p1046_p13, %p1321_p6 }
 0x5a9   : > { %p1044_p1 = pneg %p1043_p0 }
 0x5ab   : > { %1200 = dma.done.wait (%p1044_p1), %s905_s17, 256  }
 0x5ac   : > { %1202 = vsyncadd (%p1044_p1), %s905_s17, 4294967040  ;;  %p18_p2 = scmp.ge.s32.totalorder %s1304_s11, 4   ;;  %s1492_s27 = smov %s1209_s28 }
 0x5ad   : > { %s1493_s28 = smov %s1213_s29  ;;  %s1494_s29 = smov %s1315_s14 }
 0x5ae   : > { %s1495_s30 = smov %s1304_s11  ;;  %20 = sbr.rel (!%p18_p2) target bundleno = 3 (0x3), region = 87 }
 0x5b3   :  { %910 = vsyncpa [#allocation3], 1 }
 0x5b4   :  { %912 = vsyncpa [#allocation3 + $0x1], 1 }

</bundles_post_ra>
